<compile_context>
chip_gen: v6e
topology: v6e:2x2x1
jax: 0.10.0
libtpu: 0.0.40
codegen_flags: <defaults>
</compile_context>

<pallas_src>
import functools

import jax
import jax.numpy as jnp
from jax import lax
from jax.experimental import pallas as pl
from jax.experimental.pallas import tpu as pltpu


# ----------------------------------------------------------------------------
# pe buffer construction (matches the PyTorch module init)
# ----------------------------------------------------------------------------
def make_positional_encoding(embedding_dim: int, max_len: int = 5000) -> jnp.ndarray:
    position = jnp.arange(0, max_len, dtype=jnp.float32)[:, None]             # (L, 1)
    div_term = jnp.exp(
        jnp.arange(0, embedding_dim, 2, dtype=jnp.float32)
        * (-jnp.log(jnp.float32(10000.0)) / embedding_dim)
    )
    pe = jnp.zeros((max_len, embedding_dim), dtype=jnp.float32)
    pe = pe.at[:, 0::2].set(jnp.sin(position * div_term))
    if embedding_dim % 2 == 1:
        pe = pe.at[:, 1::2].set(jnp.cos(position * div_term[:-1]))
    else:
        pe = pe.at[:, 1::2].set(jnp.cos(position * div_term))
    return pe[:, None, :]                                                      # (L, 1, E)


# ----------------------------------------------------------------------------
# tile sizing
# ----------------------------------------------------------------------------
def _target_tile_bytes() -> int:
    """3 MiB x-tiles by default; ~6 MiB on v7x-like chips (64 MiB VMEM, 2x HBM BW)."""
    try:
        info = pltpu.get_tpu_info()
        vmem = int(getattr(info, "vmem_capacity_bytes", 128 << 20))
        return (6 << 20) if vmem <= (64 << 20) else (3 << 20)
    except Exception:
        return 3 << 20


def _pick_block_s(S: int, B: int, E: int, itemsize: int = 4, min_steps: int = 4) -> int:
    """Sequence rows per tile: ~target bytes per x tile, >=min_steps grid steps
    when the array is big enough (keeps both v7x TensorCores pipelined)."""
    row_bytes = max(1, B * E * itemsize)
    target = _target_tile_bytes()
    block_s = max(1, min(S, target // row_bytes))
    if S * row_bytes > (2 << 20):
        block_s = min(block_s, max(1, -(-S // min_steps)))     # cdiv(S, min_steps)
    return int(block_s)


# ----------------------------------------------------------------------------
# kernels
# ----------------------------------------------------------------------------
def _i32(v: int) -> jnp.int32:
    """Python int -> int32 constant with two's-complement wrapping."""
    v &= 0xFFFFFFFF
    if v >= (1 << 31):
        v -= 1 << 32
    return jnp.int32(v)


def _pe_eval_kernel(x_ref, pe_ref, o_ref):
    # (block_s, B, E) + (block_s, 1, E): broadcast over a size-1 dim, no repeat.
    o_ref[...] = x_ref[...] + pe_ref[...]


def _pe_train_kernel(seed_ref, x_ref, pe_ref, o_ref, *, block_s, batch, embed, dropout_p):
    y = x_ref[...] + pe_ref[...]

    keep_prob = 1.0 - float(dropout_p)
    shape = y.shape                                              # (block_s, B, E)

    # Global per-element counter (independent of the tiling, so the dropout mask
    # does not change with block_s).  Assumes S*B*E < 2^31 elements.
    s_off = pl.program_id(0) * block_s
    i_s = lax.broadcasted_iota(jnp.int32, shape, 0) + s_off
    i_b = lax.broadcasted_iota(jnp.int32, shape, 1)
    i_e = lax.broadcasted_iota(jnp.int32, shape, 2)
    idx = (i_s * batch + i_b) * embed + i_e

    # splitmix32-style finalizer: plain VPU ops (wrapping int32 mul, xor,
    # logical shifts) — lowers on TPU and in interpret mode, unlike prng_seed.
    # ~15 VPU ops/element: hidden under HBM DMA on v5e/v6e, ~at the compute
    # budget on v7x (train mode only).
    h = idx ^ (seed_ref[0] * _i32(0x9E3779B9))
    h = h ^ lax.shift_right_logical(h, jnp.int32(16))
    h = h * _i32(0x7FEB352D)
    h = h ^ lax.shift_right_logical(h, jnp.int32(15))
    h = h * _i32(0x846CA68B)
    h = h ^ lax.shift_right_logical(h, jnp.int32(16))

    # Exact integer-threshold Bernoulli: keep <=> uint32(h) < keep_prob * 2^32.
    # (Bias is <= 2^-32 from the clamp — negligible.)  Unsigned compare done in
    # signed space by flipping the MSB of both sides (one XOR, no float ops).
    thresh_u = min(int(round(keep_prob * float(1 << 32))), (1 << 32) - 1)
    keep = (h ^ _i32(0x80000000)) < _i32(thresh_u ^ (1 << 31))

    scale = jnp.float32(1.0 / keep_prob)
    o_ref[...] = jnp.where(keep, y * scale, jnp.zeros_like(y))


# ----------------------------------------------------------------------------
# wrapper
# ----------------------------------------------------------------------------
def positional_encoding(x, pe, *, dropout_p=0.1, train=False, seed=0,
                        block_s=None, donate_x=False):
    """x: (S, B, E) float32; pe: (max_len, 1, E) float32.  Returns (S, B, E)."""
    S, B, E = x.shape
    pe_s = pe[:S]                                                # (S, 1, E)

    use_dropout = bool(train) and float(dropout_p) > 0.0
    if use_dropout and float(dropout_p) >= 1.0:                  # degenerate: drop all
        return jnp.zeros_like(x)

    if block_s is None:
        block_s = _pick_block_s(S, B, E, x.dtype.itemsize)
    block_s = int(max(1, min(block_s, S)))
    grid = (pl.cdiv(S, block_s),)                                # ragged last tile OK

    x_block = (block_s, B, E)                                    # last two dims = full dims
    pe_block = (block_s, 1, E)

    cparams = pltpu.CompilerParams(
        dimension_semantics=("parallel",),
        # headroom over the default scoped limit on every generation; footprint
        # (2*x + 2*out + 2*pe tiles) stays well below this by construction.
        vmem_limit_bytes=32 << 20,
    )
    out_shape = jax.ShapeDtypeStruct((S, B, E), x.dtype)

    if use_dropout:
        kernel = functools.partial(
            _pe_train_kernel, block_s=block_s, batch=B, embed=E,
            dropout_p=float(dropout_p))
        grid_spec = pltpu.PrefetchScalarGridSpec(
            num_scalar_prefetch=1,
            grid=grid,
            in_specs=[pl.BlockSpec(x_block, lambda i, _: (i, 0, 0)),
                      pl.BlockSpec(pe_block, lambda i, _: (i, 0, 0))],
            out_specs=pl.BlockSpec(x_block, lambda i, _: (i, 0, 0)),
        )
        alias = {1: 0} if donate_x else {}                       # x is operand 1 (after seed)
        seed_arr = jnp.asarray([seed], dtype=jnp.int32)
        args = (seed_arr, x, pe_s)
    else:
        kernel = _pe_eval_kernel
        grid_spec = pl.GridSpec(
            grid=grid,
            in_specs=[pl.BlockSpec(x_block, lambda i: (i, 0, 0)),
                      pl.BlockSpec(pe_block, lambda i: (i, 0, 0))],
            out_specs=pl.BlockSpec(x_block, lambda i: (i, 0, 0)),
        )
        alias = {0: 0} if donate_x else {}
        args = (x, pe_s)

    return pl.pallas_call(
        kernel,
        out_shape=out_shape,
        grid_spec=grid_spec,
        compiler_params=cparams,
        input_output_aliases=alias,
    )(*args)


# ----------------------------------------------------------------------------
# demo / self-test
# ----------------------------------------------------------------------------
if __name__ == "__main__":
    # 1) Small eval-mode case (seq=8, batch=2, embed=32): dropout is identity.
    S, B, E = 8, 2, 32
    x = jax.random.normal(jax.random.PRNGKey(0), (S, B, E), dtype=jnp.float32)
    pe = make_positional_encoding(embedding_dim=E, max_len=5000)
    out = jax.block_until_ready(positional_encoding(x, pe, dropout_p=0.1, train=False))
    ref = x + pe[:S]
    assert out.shape == (S, B, E) and out.dtype == jnp.float32
    assert jnp.allclose(out, ref, atol=1e-6, rtol=1e-6), "mismatch vs reference (small)"

    # 2) Lane-dense tiled eval (E=128, forced 4 grid steps -> pipelined, megacore).
    S2, B2, E2 = 256, 4, 128
    x2 = jax.random.normal(jax.random.PRNGKey(1), (S2, B2, E2), dtype=jnp.float32)
    pe2 = make_positional_encoding(embedding_dim=E2, max_len=5000)
    out2 = jax.block_until_ready(positional_encoding(x2, pe2, train=False, block_s=64))
    ref2 = x2 + pe2[:S2]
    assert jnp.allclose(out2, ref2, atol=1e-6, rtol=1e-6), "mismatch vs reference (tiled)"

    # 3) Ragged last tile: S=72 with block_s=32 -> grid=3, last block of 8 rows.
    S3, B3, E3 = 72, 2, 128
    x3 = jax.random.normal(jax.random.PRNGKey(2), (S3, B3, E3), dtype=jnp.float32)
    pe3 = make_positional_encoding(embedding_dim=E3, max_len=5000)
    out3 = jax.block_until_ready(positional_encoding(x3, pe3, train=False, block_s=32))
    ref3 = x3 + pe3[:S3]
    assert jnp.allclose(out3, ref3, atol=1e-6, rtol=1e-6), "mismatch vs reference (ragged)"

    # 4) Train mode: every element is 0 (dropped) or (x+pe)/keep_prob (kept), and
    #    the empirical keep rate is near keep_prob.  Counter-hash mask spans tiles.
    p = 0.25
    out4 = jax.block_until_ready(
        positional_encoding(x2, pe2, dropout_p=p, train=True, seed=123, block_s=64))
    scaled = ref2 / (1.0 - p)
    ok = jnp.all(jnp.isclose(out4, scaled, atol=1e-5, rtol=1e-5) | (out4 == 0.0))
    assert bool(ok), "dropout produced values other than 0 or scaled(x+pe)"
    keep_frac = float(jnp.mean((out4 != 0.0).astype(jnp.float32)))
    assert 0.6 < keep_frac < 0.9, f"dropout keep fraction off: {keep_frac}"

    print("KERNEL_OK")
</pallas_src>

<mosaic_0001>
module attributes {stable_mosaic.version = 11 : i64} {
  func.func @_pe_eval_kernel(%arg0: i32, %arg1: memref<8x2x32xf32, #tpu.memory_space<vmem>>, %arg2: memref<8x1x32xf32, #tpu.memory_space<vmem>>, %arg3: memref<8x2x32xf32, #tpu.memory_space<vmem>>) attributes {dimension_semantics = [#tpu.dimension_semantics<parallel>], iteration_bounds = array<i64: 1>, scalar_prefetch = 0 : i64, scratch_operands = 0 : i64, tpu.core_type = #tpu.core_type<tc>, window_params = [{transform_indices = @transform_0, window_bounds = array<i64: 8, 2, 32>}, {transform_indices = @transform_1, window_bounds = array<i64: 8, 1, 32>}, {transform_indices = @transform_2, window_bounds = array<i64: 8, 2, 32>}]} {
    %c0 = arith.constant 0 : index
    %c0_0 = arith.constant 0 : index
    %c0_1 = arith.constant 0 : index
    %0 = vector.load %arg1[%c0, %c0_0, %c0_1] : memref<8x2x32xf32, #tpu.memory_space<vmem>>, vector<8x2x32xf32>
    %c0_2 = arith.constant 0 : index
    %c0_3 = arith.constant 0 : index
    %c0_4 = arith.constant 0 : index
    %1 = vector.load %arg2[%c0_2, %c0_3, %c0_4] : memref<8x1x32xf32, #tpu.memory_space<vmem>>, vector<8x1x32xf32>
    %2 = vector.broadcast %1 : vector<8x1x32xf32> to vector<8x2x32xf32>
    %3 = arith.addf %0, %2 : vector<8x2x32xf32>
    %c0_5 = arith.constant 0 : index
    %c0_6 = arith.constant 0 : index
    %c0_7 = arith.constant 0 : index
    %4 = vector.load %arg3[%c0_5, %c0_6, %c0_7] : memref<8x2x32xf32, #tpu.memory_space<vmem>>, vector<8x2x32xf32>
    tpu.vector_store %arg3[%c0_5, %c0_6, %c0_7], %3 {strides = array<i32>} : memref<8x2x32xf32, #tpu.memory_space<vmem>>, vector<8x2x32xf32>,
    return
  }
  func.func @transform_0(%arg0: i32) -> (i32, i32, i32) {
    %c0_i32 = arith.constant 0 : i32
    %c0_i32_0 = arith.constant 0 : i32
    %c0_i32_1 = arith.constant 0 : i32
    return %arg0, %c0_i32, %c0_i32_0 : i32, i32, i32
  }
  func.func @transform_1(%arg0: i32) -> (i32, i32, i32) {
    %c0_i32 = arith.constant 0 : i32
    %c0_i32_0 = arith.constant 0 : i32
    %c0_i32_1 = arith.constant 0 : i32
    return %arg0, %c0_i32, %c0_i32_0 : i32, i32, i32
  }
  func.func @transform_2(%arg0: i32) -> (i32, i32, i32) {
    %c0_i32 = arith.constant 0 : i32
    %c0_i32_0 = arith.constant 0 : i32
    %c0_i32_1 = arith.constant 0 : i32
    return %arg0, %c0_i32, %c0_i32_0 : i32, i32, i32
  }
}

</mosaic_0001>

<bundles_post_ra>
// kernel: tpu_custom_call.1
= control target key start
LH: loop header
LB: loop body
LE: loop exit
PB: predicated region body
PF: predicated region fallthrough
CT: control target
= control target key end

     0   :  { %7 = vsyncpa [#allocation3], 0  ;;  %s268_s0 = inlined_call_operand.hbm [shape: f32[8,2,32], index: 0, kind: input, shape index: {}]   ;;  %s269_s1 = inlined_call_operand.hbm [shape: f32[8,1,32], index: 1, kind: input, shape index: {}]   ;;  %s270_s2 = inlined_call_operand.hbm [shape: f32[8,2,32], index: 2, kind: output, shape index: {}]  }
   0x1   :  { %8 = vsyncpa [#allocation6], 0 }
   0x2   :  { %9 = vsyncpa [#allocation4], 0  ;;  %s220_s9 = smov [#allocation2]  }
   0x3   :  { %s15_s10 = sshll.u32 %s220_s9, 4  ;;  %s16_s10 = int_to_ptr.vmem [resolvable:$true] %s15_s10 }
   0x4   :  { %s162_s11 = scalar_lea.vmem %s16_s10, 256  ;;  %p167_p1 = scmp.lt.s32.totalorder %s16_s10, %s16_s10 }
   0x5   :  { %p163_p0 = scmp.ne.s32.totalorder %s16_s10, %s162_s11  ;;  %p168_p2 = scmp.lt.s32.totalorder %s162_s11, %s162_s11 }
   0x7   :  { %p169_p3 = por %p168_p2, %p167_p1 }
   0x9   :  { %p170_p4 = pnand %p169_p3, %p163_p0 }
   0xb   :  { %173 = shalt.err (!%p170_p4)
}
   0xc   :  { %s221_s12 = smov 32   ;;  %s222_s13 = smov 2  }
   0xd   :  { %21 = dma.hbm_to_vmem [thread:$0]  %s268_s0, 256, %s16_s10, [#allocation3], %s221_s12, %s221_s12, %s222_s13  }
   0xe   :  { %s223_s16 = smov [#allocation5]  }
   0xf   :  { %s27_s17 = sshll.u32 %s223_s16, 4  ;;  %s28_s17 = int_to_ptr.vmem [resolvable:$true] %s27_s17 }
  0x10   :  { %s182_s18 = scalar_lea.vmem %s28_s17, 128  ;;  %p187_p6 = scmp.lt.s32.totalorder %s28_s17, %s28_s17 }
  0x11   :  { %p183_p5 = scmp.ne.s32.totalorder %s28_s17, %s182_s18  ;;  %p188_p7 = scmp.lt.s32.totalorder %s182_s18, %s182_s18 }
  0x13   :  { %p189_p8 = por %p188_p7, %p187_p6 }
  0x15   :  { %p190_p9 = pnand %p189_p8, %p183_p5 }
  0x17   :  { %193 = shalt.err (!%p190_p9)
}
  0x18   :  { %s224_s19 = smov 16   ;;  %s225_s20 = smov 1  }
  0x19   :  { %33 = dma.hbm_to_vmem [thread:$0]  %s269_s1, 128, %s28_s17, [#allocation6], %s224_s19, %s224_s19, %s225_s20  }
  0x1a   :  { %214 = dma.done.wait [#allocation3], 256  }
  0x1b   :  { %215 = vsyncadd [#allocation3], 4294967040 }
  0x1c   :  { %216 = dma.done.wait [#allocation6], 128  }
  0x1d   :  { %217 = vsyncadd [#allocation6], 4294967168  ;;  %vm112_vm0 = vcmask 254976   ;;  %s226_s0 = smov [#allocation7]   ;;  %v40_v0 = vld [vmem:[#allocation2] sm:$0x3] }
  0x1e   :  { %s251_s23 = sshll.u32 %s226_s0, 4  ;;  %v139_v1 = vld [vmem:[#allocation5] ss:$0 sm:$0xff]  ;;  %v41_v2 = vld [vmem:[#allocation2 + $0x2] sm:$0x3]  ;;  %s127_s23 = int_to_ptr.vmem [resolvable:$true] %s251_s23 }
  0x1f   :  { %v104_v3 = vadd.f32 %v139_v1, %v40_v0  ;;  %v140_v4 = vld [vmem:[#allocation5 + $0x1] ss:$0 sm:$0xff]  ;;  %v42_v5 = vld [vmem:[#allocation2 + $0x4] sm:$0x3]  ;;  %v141_v6 = vld [vmem:[#allocation5 + $0x2] ss:$0 sm:$0xff]  ;;  %p199_p11 = scmp.lt.s32.totalorder %s127_s23, %s127_s23 }
  0x20   :  { %v105_v7 = vadd.f32 %v140_v4, %v41_v2  ;;  %v106_v8 = vadd.f32 %v141_v6, %v42_v5  ;;  %v43_v9 = vld [vmem:[#allocation2 + $0x6] sm:$0x3]  ;;  %v142_v10 = vld [vmem:[#allocation5 + $0x3] ss:$0 sm:$0xff]  ;;  %v44_v11 = vld [vmem:[#allocation2 + $0x8] sm:$0x3] }
  0x21   :  { %113 = vst.msk [vmem:[#allocation7] sm:$0x3] %vm112_vm0, %v104_v3  ;;  %v107_v12 = vadd.f32 %v142_v10, %v43_v9  ;;  %v143_v13 = vld [vmem:[#allocation5 + $0x4] ss:$0 sm:$0xff]  ;;  %v45_v14 = vld [vmem:[#allocation2 + $0xa] sm:$0x3] }
  0x22   :  { %v144_v15 = vld [vmem:[#allocation5 + $0x5] ss:$0 sm:$0xff]  ;;  %114 = vst.msk [vmem:[#allocation7 + $0x2] sm:$0x3] %vm112_vm0, %v105_v7  ;;  %115 = vst.msk [vmem:[#allocation7 + $0x4] sm:$0x3] %vm112_vm0, %v106_v8  ;;  %v108_v16 = vadd.f32 %v143_v13, %v44_v11 }
  0x23   :  { %v109_v17 = vadd.f32 %v144_v15, %v45_v14  ;;  %v46_v18 = vld [vmem:[#allocation2 + $0xc] sm:$0x3]  ;;  %v145_v19 = vld [vmem:[#allocation5 + $0x6] ss:$0 sm:$0xff]  ;;  %v47_v20 = vld [vmem:[#allocation2 + $0xe] sm:$0x3] }
  0x24   :  { %116 = vst.msk [vmem:[#allocation7 + $0x6] sm:$0x3] %vm112_vm0, %v107_v12  ;;  %v110_v21 = vadd.f32 %v145_v19, %v46_v18  ;;  %v146_v22 = vld [vmem:[#allocation5 + $0x7] ss:$0 sm:$0xff]  ;;  %117 = vst.msk [vmem:[#allocation7 + $0x8] sm:$0x3] %vm112_vm0, %v108_v16 }
  0x25   :  { %118 = vst.msk [vmem:[#allocation7 + $0xa] sm:$0x3] %vm112_vm0, %v109_v17  ;;  %v111_v23 = vadd.f32 %v146_v22, %v47_v20  ;;  %s194_s1 = scalar_lea.vmem %s127_s23, 256 }
  0x26   :  { %119 = vst.msk [vmem:[#allocation7 + $0xc] sm:$0x3] %vm112_vm0, %v110_v21  ;;  %p195_p10 = scmp.ne.s32.totalorder %s127_s23, %s194_s1  ;;  %p200_p12 = scmp.lt.s32.totalorder %s194_s1, %s194_s1 }
  0x27   :  { %120 = vst.msk [vmem:[#allocation7 + $0xe] sm:$0x3] %vm112_vm0, %v111_v23 }
  0x28   :  { %p201_p13 = por %p200_p12, %p199_p11 }
  0x2a   :  { %p202_p0 = pnand %p201_p13, %p195_p10 }
  0x2c   :  { %205 = shalt.err (!%p202_p0)
}
  0x2d   :  { %132 = dma.vmem_to_hbm [thread:$0]  %s127_s23, 256, %s270_s2, [#allocation4], %s221_s12, %s221_s12, %s222_s13  }
  0x2e   :  { %218 = dma.done.wait [#allocation4], 256  }
  0x2f   :  { %219 = vsyncadd [#allocation4], 4294967040 }
  0x30   :  { %136 = vsyncpa [#allocation3], 1 }
  0x31   :  { %137 = vsyncpa [#allocation6], 1 }
  0x32   :  { %138 = vsyncpa [#allocation4], 1 }

</bundles_post_ra>
